<compile_context>
chip_gen: v6e
topology: v6e:2x2x1
jax: 0.10.0
libtpu: 0.0.40
codegen_flags: <defaults>
</compile_context>

<pallas_src>
import functools

import jax
import jax.numpy as jnp
from jax.experimental import pallas as pl
from jax.experimental.pallas import tpu as pltpu


# ----------------------------------------------------------------------------
# Prologue: per-node decoder + pairwise projections  (O(B*N*E^2), negligible)
# ----------------------------------------------------------------------------
def _node_proj_kernel(z_ref, w0_ref, b0_ref, wa_ref, ba_ref, wb_ref, bb_ref,
                      ai_ref, aj_ref):
    h = jnp.maximum(
        jnp.dot(z_ref[...], w0_ref[...], preferred_element_type=jnp.float32)
        + b0_ref[...], 0.0)                                              # (TM, E)
    ai_ref[...] = (jnp.dot(h, wa_ref[...], preferred_element_type=jnp.float32)
                   + ba_ref[...]).astype(ai_ref.dtype)                   # (TM, G*E)
    aj_ref[...] = (jnp.dot(h, wb_ref[...], preferred_element_type=jnp.float32)
                   + bb_ref[...]).astype(aj_ref.dtype)                   # (TM, E)


# ----------------------------------------------------------------------------
# Pairwise stage: one (TI x TJ) tile of the pair matrix per grid step,
# with G j-nodes packed per lane-row and block-diagonal folded weights.
# ----------------------------------------------------------------------------
def _pairwise_kernel(ai_ref, aj_ref, w34_ref, b34_ref, w5_ref, b5_ref, out_ref,
                     *, ew_dtype):
    ti, p = ai_ref.shape[1], ai_ref.shape[2]        # P = G*E
    tjg = aj_ref.shape[1]                           # TJ // G packed groups
    gc = w5_ref.shape[1]                            # G * Cout
    mm_dtype = w34_ref.dtype

    ai = ai_ref[0].astype(ew_dtype)                                  # (TI, P)
    aj = aj_ref[0].astype(ew_dtype)                                  # (TJG, P)
    # packed pre-activation: pre[i, jg, g*E:(g+1)*E] = a_i[i] + a_j[jg*G + g]
    pre = ai[:, None, :] + aj[None, :, :]                            # (TI, TJG, P)
    q = jnp.maximum(pre, 0).reshape(ti * tjg, p).astype(mm_dtype)    # leading merge only

    # interaction_mlp[2] + edge_classifier[0] folded into one block-diag Linear
    h2 = jnp.dot(q, w34_ref[...], preferred_element_type=jnp.float32) + b34_ref[...]
    r = jnp.maximum(h2, 0.0).astype(mm_dtype)
    e = jnp.dot(r, w5_ref[...], preferred_element_type=jnp.float32) + b5_ref[...]

    out_ref[0] = e.reshape(ti, tjg, gc).astype(out_ref.dtype)        # leading split only


# ----------------------------------------------------------------------------
# Helpers
# ----------------------------------------------------------------------------
def _pick_tile(n, cap):
    for t in range(min(cap, n), 0, -1):
        if n % t == 0 and (t % 8 == 0 or t == n):
            return t
    return n


def _pick_tj(n, g, cap):
    ng = n // g
    for t in range(min(cap, n), 0, -1):
        if n % t or t % g:
            continue
        tg = t // g
        if tg % 8 == 0 or tg == ng:
            return t
    return n


def _block_diag(w, g):
    if g == 1:
        return w
    ei, eo = w.shape
    out = jnp.zeros((g * ei, g * eo), w.dtype)
    for k in range(g):
        out = out.at[k * ei:(k + 1) * ei, k * eo:(k + 1) * eo].set(w)
    return out


def _rep(a, g):
    return jnp.concatenate([a] * g, axis=-1) if g > 1 else a


def _old_vpu_device():
    try:
        kind = jax.devices()[0].device_kind.lower()
    except Exception:
        kind = ""
    return any(s in kind for s in ("v2", "v3", "v4", "v5"))


# ----------------------------------------------------------------------------
# Wrapper
# ----------------------------------------------------------------------------
def euc2edge_decoder(z, params, *, ti=None, tj=None, group=None, use_bf16=True,
                     bf16_elementwise=None, vmem_limit_bytes=48 * 1024 * 1024):
    """z: (B, N, Cin) float32 -> (B, N, N, Cout) float32."""
    B, N, Cin = z.shape
    (w0, b0, w1, b1, w2, b2, w3, b3, w4, b4, w5, b5) = params
    E = w0.shape[1]
    Cout = w5.shape[1]

    old_vpu = _old_vpu_device()
    if bf16_elementwise is None:
        bf16_elementwise = use_bf16 and not old_vpu        # no bf16 VPU on <= v5
    if group is None:
        group = 1
        for g in ((4, 2) if old_vpu else (8, 4, 2)):       # 128^2 MXU on v5e -> G=4
            if N % g == 0:
                group = g
                break
    G = group
    assert N % G == 0, (N, G)
    P = G * E
    GC = G * Cout

    # ---- offline weight folding (wrapper-side, exact) -----------------------
    w2a, w2b = w2[:E], w2[E:]                  # kernel never slices weights
    wa = w1 @ w2a                              # fold decoder's 2nd Linear into i-proj
    wb = w1 @ w2b
    ba = b1 @ w2a + b2                         # b2 folded once into the i-side bias
    bb = b1 @ w2b
    wa_rep = _rep(wa, G)                       # (E, G*E): a_i emitted pre-replicated
    ba_rep = _rep(ba, G)
    w34 = w3 @ w4                              # no ReLU between these two Linears
    b34 = b3 @ w4 + b4
    w34_blk = _block_diag(w34, G)              # (P, P)
    b34_rep = _rep(b34, G)                     # (1, P)
    w5_blk = _block_diag(w5, G)                # (P, G*Cout)
    b5_rep = _rep(b5, G)                       # (1, G*Cout)

    mm_dtype = jnp.bfloat16 if use_bf16 else jnp.float32
    ew_dtype = jnp.bfloat16 if (use_bf16 and bf16_elementwise) else jnp.float32
    store_dtype = mm_dtype                     # a_i / a_j storage (HBM traffic)
    w34_blk = w34_blk.astype(mm_dtype)
    w5_blk = w5_blk.astype(mm_dtype)
    b34_rep = b34_rep.astype(jnp.float32)
    b5_rep = b5_rep.astype(jnp.float32)

    # ---- prologue: per-node projections ------------------------------------
    BN = B * N
    z2 = z.reshape(BN, Cin)
    TM = _pick_tile(BN, 512)
    full1 = lambda a: pl.BlockSpec(a.shape, lambda m: (0,) * a.ndim)
    ai_rep, aj = pl.pallas_call(
        _node_proj_kernel,
        out_shape=(jax.ShapeDtypeStruct((BN, P), store_dtype),
                   jax.ShapeDtypeStruct((BN, E), store_dtype)),
        grid_spec=pltpu.PrefetchScalarGridSpec(
            num_scalar_prefetch=0,
            grid=(BN // TM,),
            in_specs=[pl.BlockSpec((TM, Cin), lambda m: (m, 0)),
                      full1(w0), full1(b0),
                      full1(wa_rep), full1(ba_rep), full1(wb), full1(bb)],
            out_specs=[pl.BlockSpec((TM, P), lambda m: (m, 0)),
                       pl.BlockSpec((TM, E), lambda m: (m, 0))],
        ),
        compiler_params=pltpu.CompilerParams(dimension_semantics=("parallel",)),
    )(z2, w0, b0, wa_rep, ba_rep, wb, bb)
    ai_rep = ai_rep.reshape(B, N, P)
    ajp = aj.reshape(B, N // G, P)             # free row-major regroup (j-packing)

    # ---- pairwise stage: tiled over the (N, N) pair matrix ------------------
    TI = ti if ti is not None else _pick_tile(N, 128)
    TJ = tj if tj is not None else _pick_tj(N, G, 128)
    assert N % TI == 0 and (TI % 8 == 0 or TI == N), (N, TI)
    assert N % TJ == 0 and TJ % G == 0, (N, TJ, G)
    TJG = TJ // G
    assert TJG % 8 == 0 or TJG == N // G, (TJ, G)

    rows = B * N * (N // G)
    itemsz = 2 if use_bf16 else 4
    cost = pl.CostEstimate(
        flops=2 * rows * P * (P + GC),
        transcendentals=0,
        bytes_accessed=int(rows * GC * 4                        # output
                           + B * (N // TI) * (N // G) * P * itemsz   # aj re-reads
                           + B * N * P * itemsz                 # ai reads
                           + (P * P + P * GC) * itemsz))        # weights

    full3 = lambda a: pl.BlockSpec(a.shape, lambda b, i, j: (0,) * a.ndim)
    out = pl.pallas_call(
        functools.partial(_pairwise_kernel, ew_dtype=ew_dtype),
        out_shape=jax.ShapeDtypeStruct((B, N, N // G, GC), jnp.float32),
        grid_spec=pltpu.PrefetchScalarGridSpec(
            num_scalar_prefetch=0,
            grid=(B, N // TI, N // TJ),          # j innermost: a_i stays resident
            in_specs=[pl.BlockSpec((1, TI, P), lambda b, i, j: (b, i, 0)),
                      pl.BlockSpec((1, TJG, P), lambda b, i, j: (b, j, 0)),
                      full3(w34_blk), full3(b34_rep), full3(w5_blk), full3(b5_rep)],
            out_specs=pl.BlockSpec((1, TI, TJG, GC),
                                   lambda b, i, j: (b, i, j, 0)),
        ),
        compiler_params=pltpu.CompilerParams(
            dimension_semantics=("parallel", "parallel", "parallel"),
            vmem_limit_bytes=vmem_limit_bytes),
        cost_estimate=cost,
    )(ai_rep, ajp, w34_blk, b34_rep, w5_blk, b5_rep)

    # (B, N, N//G, G*Cout) -> (B, N, N, Cout): identical row-major layout (free).
    return out.reshape(B, N, N, Cout)


# ----------------------------------------------------------------------------
# Synthetic parameters + pure-JAX reference
# ----------------------------------------------------------------------------
def make_params(key, in_channels, euc_channels, out_channels):
    def lin(k, fan_in, fan_out):
        kw, kb = jax.random.split(k)
        scale = 1.0 / jnp.sqrt(fan_in)
        w = jax.random.uniform(kw, (fan_in, fan_out), jnp.float32, -scale, scale)
        b = jax.random.uniform(kb, (1, fan_out), jnp.float32, -scale, scale)
        return w, b

    keys = jax.random.split(key, 6)
    w0, b0 = lin(keys[0], in_channels, euc_channels)         # decoder[0]
    w1, b1 = lin(keys[1], euc_channels, euc_channels)         # decoder[2]
    w2, b2 = lin(keys[2], 2 * euc_channels, euc_channels)     # interaction_mlp[0]
    w3, b3 = lin(keys[3], euc_channels, euc_channels)         # interaction_mlp[2]
    w4, b4 = lin(keys[4], euc_channels, euc_channels)         # edge_classifier[0]
    w5, b5 = lin(keys[5], euc_channels, out_channels)         # edge_classifier[2]
    return (w0, b0, w1, b1, w2, b2, w3, b3, w4, b4, w5, b5)


def reference(z, params):
    (w0, b0, w1, b1, w2, b2, w3, b3, w4, b4, w5, b5) = params
    h = jnp.maximum(z @ w0 + b0, 0.0) @ w1 + b1                     # (B, N, E)
    B, N, E = h.shape
    z_i = jnp.broadcast_to(h[:, :, None, :], (B, N, N, E))
    z_j = jnp.broadcast_to(h[:, None, :, :], (B, N, N, E))
    pair = jnp.concatenate([z_i, z_j], axis=-1)
    p = jnp.maximum(pair @ w2 + b2, 0.0) @ w3 + b3
    e = jnp.maximum(p @ w4 + b4, 0.0) @ w5 + b5
    return e


if __name__ == "__main__":
    B, N = 2, 64
    in_channels, euc_channels, out_channels = 16, 32, 4

    key = jax.random.PRNGKey(0)
    kz, kp = jax.random.split(key)
    z = jax.random.normal(kz, (B, N, in_channels), jnp.float32)
    params = make_params(kp, in_channels, euc_channels, out_channels)

    # ti=tj=32, group=4 -> grid (2, 2, 2): exercises a real multi-tile grid
    # (TJG=8 packed j-groups per tile, P=128 packed lanes).
    out = euc2edge_decoder(z, params, ti=32, tj=32, group=4)
    out = jax.block_until_ready(out)

    ref = reference(z, params)
    assert out.shape == (B, N, N, out_channels), out.shape
    # bf16 MXU operands (+ bf16 elementwise on newer chips) -> loose tolerance.
    err = float(jnp.max(jnp.abs(out - ref)))
    assert jnp.allclose(out, ref, atol=6e-2, rtol=6e-2), err

    print("KERNEL_OK")
</pallas_src>

<mosaic_0001>
module attributes {stable_mosaic.version = 11 : i64} {
  func.func @_node_proj_kernel(%arg0: i32, %arg1: memref<128x16xf32, #tpu.memory_space<vmem>>, %arg2: memref<16x32xf32, #tpu.memory_space<vmem>>, %arg3: memref<1x32xf32, #tpu.memory_space<vmem>>, %arg4: memref<32x128xf32, #tpu.memory_space<vmem>>, %arg5: memref<1x128xf32, #tpu.memory_space<vmem>>, %arg6: memref<32x32xf32, #tpu.memory_space<vmem>>, %arg7: memref<1x32xf32, #tpu.memory_space<vmem>>, %arg8: memref<128x128xbf16, #tpu.memory_space<vmem>>, %arg9: memref<128x32xbf16, #tpu.memory_space<vmem>>) attributes {dimension_semantics = [#tpu.dimension_semantics<parallel>], iteration_bounds = array<i64: 1>, scalar_prefetch = 0 : i64, scratch_operands = 0 : i64, tpu.core_type = #tpu.core_type<tc>, window_params = [{transform_indices = @transform_0, window_bounds = array<i64: 128, 16>}, {pipeline_mode = #tpu.pipeline_mode<synchronous>, transform_indices = @transform_1, window_bounds = array<i64: 16, 32>}, {pipeline_mode = #tpu.pipeline_mode<synchronous>, transform_indices = @transform_2, window_bounds = array<i64: 1, 32>}, {pipeline_mode = #tpu.pipeline_mode<synchronous>, transform_indices = @transform_3, window_bounds = array<i64: 32, 128>}, {pipeline_mode = #tpu.pipeline_mode<synchronous>, transform_indices = @transform_4, window_bounds = array<i64: 1, 128>}, {pipeline_mode = #tpu.pipeline_mode<synchronous>, transform_indices = @transform_5, window_bounds = array<i64: 32, 32>}, {pipeline_mode = #tpu.pipeline_mode<synchronous>, transform_indices = @transform_6, window_bounds = array<i64: 1, 32>}, {transform_indices = @transform_7, window_bounds = array<i64: 128, 128>}, {transform_indices = @transform_8, window_bounds = array<i64: 128, 32>}]} {
    %c0 = arith.constant 0 : index
    %c0_0 = arith.constant 0 : index
    %0 = vector.load %arg1[%c0, %c0_0] : memref<128x16xf32, #tpu.memory_space<vmem>>, vector<128x16xf32>
    %c0_1 = arith.constant 0 : index
    %c0_2 = arith.constant 0 : index
    %1 = vector.load %arg2[%c0_1, %c0_2] : memref<16x32xf32, #tpu.memory_space<vmem>>, vector<16x32xf32>
    %cst = arith.constant dense<0.000000e+00> : vector<128x32xf32>
    %2 = tpu.matmul %0, %1, %cst {dimension_numbers = #tpu.dot_dimension_numbers<[1], [0], [0], [1], [0, 0, 1, 1], [], []>} : vector<128x16xf32>, vector<16x32xf32>, vector<128x32xf32> -> vector<128x32xf32>
    %c0_3 = arith.constant 0 : index
    %c0_4 = arith.constant 0 : index
    %3 = vector.load %arg3[%c0_3, %c0_4] : memref<1x32xf32, #tpu.memory_space<vmem>>, vector<1x32xf32>
    %4 = vector.broadcast %3 : vector<1x32xf32> to vector<128x32xf32>
    %5 = arith.addf %2, %4 : vector<128x32xf32>
    %cst_5 = arith.constant 0.000000e+00 : f32
    %6 = vector.broadcast %cst_5 : f32 to vector<128x32xf32>
    %7 = arith.maximumf %5, %6 : vector<128x32xf32>
    %c0_6 = arith.constant 0 : index
    %c0_7 = arith.constant 0 : index
    %8 = vector.load %arg4[%c0_6, %c0_7] : memref<32x128xf32, #tpu.memory_space<vmem>>, vector<32x128xf32>
    %cst_8 = arith.constant dense<0.000000e+00> : vector<128x128xf32>
    %9 = tpu.matmul %7, %8, %cst_8 {dimension_numbers = #tpu.dot_dimension_numbers<[1], [0], [0], [1], [0, 0, 1, 1], [], []>} : vector<128x32xf32>, vector<32x128xf32>, vector<128x128xf32> -> vector<128x128xf32>
    %c0_9 = arith.constant 0 : index
    %c0_10 = arith.constant 0 : index
    %10 = vector.load %arg5[%c0_9, %c0_10] : memref<1x128xf32, #tpu.memory_space<vmem>>, vector<1x128xf32>
    %11 = vector.broadcast %10 : vector<1x128xf32> to vector<128x128xf32>
    %12 = arith.addf %9, %11 : vector<128x128xf32>
    %13 = arith.truncf %12 : vector<128x128xf32> to vector<128x128xbf16>
    %c0_11 = arith.constant 0 : index
    %c0_12 = arith.constant 0 : index
    %14 = vector.load %arg8[%c0_11, %c0_12] : memref<128x128xbf16, #tpu.memory_space<vmem>>, vector<128x128xbf16>
    tpu.vector_store %arg8[%c0_11, %c0_12], %13 {strides = array<i32>} : memref<128x128xbf16, #tpu.memory_space<vmem>>, vector<128x128xbf16>,
    %c0_13 = arith.constant 0 : index
    %c0_14 = arith.constant 0 : index
    %15 = vector.load %arg6[%c0_13, %c0_14] : memref<32x32xf32, #tpu.memory_space<vmem>>, vector<32x32xf32>
    %cst_15 = arith.constant dense<0.000000e+00> : vector<128x32xf32>
    %16 = tpu.matmul %7, %15, %cst_15 {dimension_numbers = #tpu.dot_dimension_numbers<[1], [0], [0], [1], [0, 0, 1, 1], [], []>} : vector<128x32xf32>, vector<32x32xf32>, vector<128x32xf32> -> vector<128x32xf32>
    %c0_16 = arith.constant 0 : index
    %c0_17 = arith.constant 0 : index
    %17 = vector.load %arg7[%c0_16, %c0_17] : memref<1x32xf32, #tpu.memory_space<vmem>>, vector<1x32xf32>
    %18 = vector.broadcast %17 : vector<1x32xf32> to vector<128x32xf32>
    %19 = arith.addf %16, %18 : vector<128x32xf32>
    %20 = arith.truncf %19 : vector<128x32xf32> to vector<128x32xbf16>
    %c0_18 = arith.constant 0 : index
    %c0_19 = arith.constant 0 : index
    %21 = vector.load %arg9[%c0_18, %c0_19] : memref<128x32xbf16, #tpu.memory_space<vmem>>, vector<128x32xbf16>
    tpu.vector_store %arg9[%c0_18, %c0_19], %20 {strides = array<i32>} : memref<128x32xbf16, #tpu.memory_space<vmem>>, vector<128x32xbf16>,
    return
  }
  func.func @transform_0(%arg0: i32) -> (i32, i32) {
    %c0_i32 = arith.constant 0 : i32
    %c0_i32_0 = arith.constant 0 : i32
    return %arg0, %c0_i32 : i32, i32
  }
  func.func @transform_1(%arg0: i32) -> (i32, i32) {
    %c0_i32 = arith.constant 0 : i32
    %c0_i32_0 = arith.constant 0 : i32
    %c0_i32_1 = arith.constant 0 : i32
    return %c0_i32, %c0_i32_0 : i32, i32
  }
  func.func @transform_2(%arg0: i32) -> (i32, i32) {
    %c0_i32 = arith.constant 0 : i32
    %c0_i32_0 = arith.constant 0 : i32
    %c0_i32_1 = arith.constant 0 : i32
    return %c0_i32, %c0_i32_0 : i32, i32
  }
  func.func @transform_3(%arg0: i32) -> (i32, i32) {
    %c0_i32 = arith.constant 0 : i32
    %c0_i32_0 = arith.constant 0 : i32
    %c0_i32_1 = arith.constant 0 : i32
    return %c0_i32, %c0_i32_0 : i32, i32
  }
  func.func @transform_4(%arg0: i32) -> (i32, i32) {
    %c0_i32 = arith.constant 0 : i32
    %c0_i32_0 = arith.constant 0 : i32
    %c0_i32_1 = arith.constant 0 : i32
    return %c0_i32, %c0_i32_0 : i32, i32
  }
  func.func @transform_5(%arg0: i32) -> (i32, i32) {
    %c0_i32 = arith.constant 0 : i32
    %c0_i32_0 = arith.constant 0 : i32
    %c0_i32_1 = arith.constant 0 : i32
    return %c0_i32, %c0_i32_0 : i32, i32
  }
  func.func @transform_6(%arg0: i32) -> (i32, i32) {
    %c0_i32 = arith.constant 0 : i32
    %c0_i32_0 = arith.constant 0 : i32
    %c0_i32_1 = arith.constant 0 : i32
    return %c0_i32, %c0_i32_0 : i32, i32
  }
  func.func @transform_7(%arg0: i32) -> (i32, i32) {
    %c0_i32 = arith.constant 0 : i32
    %c0_i32_0 = arith.constant 0 : i32
    return %arg0, %c0_i32 : i32, i32
  }
  func.func @transform_8(%arg0: i32) -> (i32, i32) {
    %c0_i32 = arith.constant 0 : i32
    %c0_i32_0 = arith.constant 0 : i32
    return %arg0, %c0_i32 : i32, i32
  }
}

</mosaic_0001>

<bundles_post_ra>
// kernel: tpu_custom_call.1
= control target key start
LH: loop header
LB: loop body
LE: loop exit
PB: predicated region body
PF: predicated region fallthrough
CT: control target
= control target key end

     0   :  { %vm54_vm0 = vcmask 130048   ;;  %s1451_s0 = inlined_call_operand.vmem [shape: f32[128,16], index: 0, kind: input, shape index: {}]   ;;  %s1452_s1 = inlined_call_operand.vmem [shape: f32[16,32], index: 1, kind: input, shape index: {}]   ;;  %s1453_s2 = inlined_call_operand.vmem [shape: f32[1,32], index: 2, kind: input, shape index: {}]   ;;  %s1454_s3 = inlined_call_operand.vmem [shape: f32[32,128], index: 3, kind: input, shape index: {}]   ;;  %s1455_s4 = inlined_call_operand.vmem [shape: f32[1,128], index: 4, kind: input, shape index: {}]   ;;  %s1456_s5 = inlined_call_operand.vmem [shape: f32[32,32], index: 5, kind: input, shape index: {}]   ;;  %s1457_s6 = inlined_call_operand.vmem [shape: f32[1,32], index: 6, kind: input, shape index: {}]   ;;  %s1458_s7 = inlined_call_operand.hbm [shape: bf16[128,128], index: 7, kind: output, shape index: {0}]   ;;  %s1459_s8 = inlined_call_operand.vmem [shape: bf16[128,32], index: 8, kind: output, shape index: {1}]  }
   0x1   :  { %v46_v0 = vld [vmem:[%s1452_s1 + $0x8] sm:$0xff]  ;;  %v45_v1 = vld [vmem:[%s1452_s1] sm:$0xff]  ;;  %v31_v4 = vld [vmem:[%s1451_s0 + $0x10] sm:$0xff] }
   0x2   :  { %v29_v2 = vld [vmem:[%s1451_s0] sm:$0xff]  ;;  %1026 = vmatprep.subr.mxu0 %v46_v0  ;;  %v30_v3 = vld [vmem:[%s1451_s0 + $0x8] sm:$0xff]  ;;  %1118 = vmatprep.subr.mxu1 %v46_v0  ;;  %v39_v7 = vld [vmem:[%s1451_s0 + $0x50] sm:$0xff] }
   0x3   :  { %1030 = vmatprep.mubr.msk.f32.mxu0 %vm54_vm0, %v29_v2  ;;  %1027 = vmatpush3.msra.mxu0 %v46_v0  ;;  %v37_v5 = vld [vmem:[%s1451_s0 + $0x40] sm:$0xff]  ;;  %v38_v6 = vld [vmem:[%s1451_s0 + $0x48] sm:$0xff]  ;;  %v32_v8 = vld [vmem:[%s1451_s0 + $0x18] sm:$0xff] }
   0x4   :  { %1028 = vmatprep.subr.mxu0 %v45_v1  ;;  %1120 = vmatpush3.msra.mxu1 %v46_v0  ;;  %v267_v9 = vld [vmem:[%s1454_s3 + $0x18] sm:$0xff]  ;;  %v33_v11 = vld [vmem:[%s1451_s0 + $0x20] sm:$0xff] }
   0x5   :  { %1029 = vmatpush3.msra.mxu0 %v45_v1  ;;  %1119 = vmatprep.subr.mxu1 %v45_v1  ;;  %v552_v10 = vld [vmem:[%s1456_s5 + $0x18] sm:$0xff] }
   0x6   :  { %1031 = vmatmul.mubr.msk.f32.vlgmr.msra.gmra.mxu0 %vm54_vm0, %v30_v3  ;;  %1121 = vmatpush3.msra.mxu1 %v45_v1 }
   0x7   :  { %1033 = vmatprep.mubr.msk.f32.mxu0 %vm54_vm0, %v31_v4  ;;  %1042 = vmatprep.mubr.msk.f32.mxu1 %vm54_vm0, %v37_v5 }
   0x8   :  { %1043 = vmatmul.mubr.msk.f32.vlgmr.msra.gmra.mxu1 %vm54_vm0, %v38_v6  ;;  %1054 = vmatprep.subr.mxu1 %v267_v9 }
   0x9   :  { %14 = vsyncpa [#allocation3], 0  ;;  %1045 = vmatprep.mubr.msk.f32.mxu1 %vm54_vm0, %v39_v7  ;;  %v40_v12 = vld [vmem:[%s1451_s0 + $0x58] sm:$0xff]  ;;  %1055 = vmatpush3.msra.mxu1 %v267_v9  ;;  %v266_v13 = vld [vmem:[%s1454_s3 + $0x10] sm:$0xff]  ;;  %vm275_vm1 = vcmask 261120   ;;  %vm769_vm2 = vcmask 257024  }
   0xa   :  { %1034 = vmatmul.mubr.msk.f32.gmra.mxu0 %vm54_vm0, %v32_v8  ;;  %v41_v14 = vld [vmem:[%s1451_s0 + $0x60] sm:$0xff]  ;;  %1086 = vmatprep.subr.mxu0 %v552_v10  ;;  %v34_v15 = vld [vmem:[%s1451_s0 + $0x28] sm:$0xff]  ;;  %v551_v16 = vld [vmem:[%s1456_s5 + $0x10] sm:$0xff] }
   0xb   :  { %1036 = vmatprep.mubr.msk.f32.mxu0 %vm54_vm0, %v33_v11  ;;  %1087 = vmatpush3.msra.mxu0 %v552_v10  ;;  %v35_v17 = vld [vmem:[%s1451_s0 + $0x30] sm:$0xff]  ;;  %v42_v18 = vld [vmem:[%s1451_s0 + $0x68] sm:$0xff]  ;;  %v36_v21 = vld [vmem:[%s1451_s0 + $0x38] sm:$0xff] }
   0xc   :  { %1046 = vmatmul.mubr.msk.f32.gmra.mxu1 %vm54_vm0, %v40_v12  ;;  %1056 = vmatprep.subr.mxu1 %v266_v13  ;;  %v265_v19 = vld [vmem:[%s1454_s3 + $0x8] sm:$0xff]  ;;  %v43_v20 = vld [vmem:[%s1451_s0 + $0x70] sm:$0xff]  ;;  %v44_v22 = vld [vmem:[%s1451_s0 + $0x78] sm:$0xff] }
   0xd   :  { %1048 = vmatprep.mubr.msk.f32.mxu1 %vm54_vm0, %v41_v14  ;;  %1057 = vmatpush3.msra.mxu1 %v266_v13  ;;  %v550_v23 = vld [vmem:[%s1456_s5 + $0x8] sm:$0xff]  ;;  %v264_v24 = vld [vmem:[%s1454_s3] sm:$0xff]  ;;  %s1147_s3 = smov [#allocation2]  }
   0xe   :  { %1037 = vmatmul.mubr.msk.f32.gmra.mxu0 %vm54_vm0, %v34_v15  ;;  %1088 = vmatprep.subr.mxu0 %v551_v16  ;;  %v549_v25 = vld [vmem:[%s1456_s5] sm:$0xff]  ;;  %s791_s5 = sshll.u32 %s1147_s3, 4  ;;  %s792_s5 = int_to_ptr.vmem [resolvable:$true] %s791_s5 }
   0xf   :  { %1039 = vmatprep.mubr.msk.f32.mxu0 %vm54_vm0, %v35_v17  ;;  %1089 = vmatpush3.msra.mxu0 %v551_v16  ;;  %v1292_v26 = vld [vmem:[%s1453_s2] ss:$0 sm:$0xff]  ;;  %s1125_s15 = scalar_lea.vmem %s792_s5, 1024  ;;  %p1130_p1 = scmp.lt.s32.totalorder %s792_s5, %s792_s5 }
  0x10   :  { %1049 = vmatmul.mubr.msk.f32.gmra.mxu1 %vm54_vm0, %v42_v18  ;;  %1058 = vmatprep.subr.mxu1 %v265_v19  ;;  %v1345_v11 = vld [vmem:[%s1457_s6] ss:$0 sm:$0xff]  ;;  %p1126_p0 = scmp.ne.s32.totalorder %s792_s5, %s1125_s15  ;;  %p1131_p2 = scmp.lt.s32.totalorder %s1125_s15, %s1125_s15 }
  0x11   :  { %1051 = vmatprep.mubr.msk.f32.mxu1 %vm54_vm0, %v43_v20  ;;  %1059 = vmatpush3.msra.mxu1 %v265_v19  ;;  %v1350_v13 = vld [vmem:[%s1455_s4] ss:$0 sm:$0xff] }
  0x12   :  { %1040 = vmatmul.mubr.msk.f32.gmra.mxu0 %vm54_vm0, %v36_v21  ;;  %1090 = vmatprep.subr.mxu0 %v550_v23  ;;  %p1132_p3 = por %p1131_p2, %p1130_p1 }
  0x13   :  { %1091 = vmatpush3.msra.mxu0 %v550_v23  ;;  %1060 = vmatprep.subr.mxu1 %v264_v24 }
  0x14   :  { %1052 = vmatmul.mubr.msk.f32.gmra.mxu1 %vm54_vm0, %v44_v22  ;;  %1092 = vmatprep.subr.mxu0 %v549_v25  ;;  %p1133_p4 = pnand %p1132_p3, %p1126_p0 }
  0x15   :  { %1061 = vmatpush3.msra.mxu1 %v264_v24  ;;  %1093 = vmatpush3.msra.mxu0 %v549_v25 }
  0xc6   :  { %v1032_v27 = vpop.f32.mrf.mxu0 }
  0xc7   :  { %v175_v28 = vadd.f32 %v1032_v27, %v1292_v26 }
  0xc8   :  { %v169_v29 = vpop.f32.mrf.mxu0  ;;  %v1044_v30 = vpop.f32.mrf.mxu1 }
  0xc9   :  { %v170_v31 = vadd.f32 %v1292_v26, %v169_v29  ;;  %v249_v35 = vmax.f32 %v175_v28, 0.0  ;;  %v215_v60 = vadd.f32 %v1044_v30, %v1292_v26 }
  0xca   :  { %v1035_v32 = vpop.f32.mrf.mxu0  ;;  %v209_v33 = vpop.f32.mrf.mxu1 }
  0xcb   :  { %v248_v34 = vmax.f32 %v170_v31, 0.0  ;;  %v185_v36 = vadd.f32 %v1035_v32, %v1292_v26  ;;  %v210_v50 = vadd.f32 %v1292_v26, %v209_v33  ;;  %v257_v0 = vmax.f32 %v215_v60, 0.0 }
  0xcc   :  { %v179_v37 = vpop.f32.mrf.mxu0  ;;  %v1047_v38 = vpop.f32.mrf.mxu1 }
  0xcd   :  { %v180_v39 = vadd.f32 %v1292_v26, %v179_v37  ;;  %1062 = vmatprep.mubr.msk.f32.mxu1 %vm275_vm1, %v248_v34  ;;  %1094 = vmatprep.mubr.msk.f32.mxu0 %vm275_vm1, %v248_v34  ;;  %v251_v43 = vmax.f32 %v185_v36, 0.0  ;;  %v256_v57 = vmax.f32 %v210_v50, 0.0  ;;  %v225_v1 = vadd.f32 %v1047_v38, %v1292_v26 }
  0xce   :  { %v1038_v40 = vpop.f32.mrf.mxu0  ;;  %1063 = vmatmul.mubr.msk.f32.vlgmr.msra.gmra.mxu1 %vm275_vm1, %v249_v35  ;;  %1095 = vmatmul.mubr.msk.f32.vlgmr.msra.gmra.mxu0 %vm275_vm1, %v249_v35  ;;  %v219_v41 = vpop.f32.mrf.mxu1 }
  0xcf   :  { %v250_v42 = vmax.f32 %v180_v39, 0.0  ;;  %v195_v44 = vadd.f32 %v1038_v40, %v1292_v26  ;;  %v220_v58 = vadd.f32 %v1292_v26, %v219_v41  ;;  %v259_v5 = vmax.f32 %v225_v1, 0.0 }
  0xd0   :  { %v189_v45 = vpop.f32.mrf.mxu0  ;;  %v1050_v46 = vpop.f32.mrf.mxu1 }
  0xd1   :  { %v190_v47 = vadd.f32 %v1292_v26, %v189_v45  ;;  %1065 = vmatprep.mubr.msk.f32.mxu1 %vm275_vm1, %v250_v42  ;;  %1097 = vmatprep.mubr.msk.f32.mxu0 %vm275_vm1, %v250_v42  ;;  %v253_v51 = vmax.f32 %v195_v44, 0.0  ;;  %v258_v62 = vmax.f32 %v220_v58, 0.0  ;;  %v235_v6 = vadd.f32 %v1050_v46, %v1292_v26 }
  0xd2   :  { %v1041_v48 = vpop.f32.mrf.mxu0  ;;  %1066 = vmatmul.mubr.msk.f32.gmra.mxu1 %vm275_vm1, %v251_v43  ;;  %1098 = vmatmul.mubr.msk.f32.gmra.mxu0 %vm275_vm1, %v251_v43  ;;  %v229_v54 = vpop.f32.mrf.mxu1 }
  0xd3   :  { %v252_v49 = vmax.f32 %v190_v47, 0.0  ;;  %v205_v52 = vadd.f32 %v1041_v48, %v1292_v26  ;;  %v230_v63 = vadd.f32 %v1292_v26, %v229_v54  ;;  %v261_v8 = vmax.f32 %v235_v6, 0.0 }
  0xd4   :  { %v199_v53 = vpop.f32.mrf.mxu0  ;;  %v1053_v61 = vpop.f32.mrf.mxu1 }
  0xd5   :  { %v200_v55 = vadd.f32 %v1292_v26, %v199_v53  ;;  %1068 = vmatprep.mubr.msk.f32.mxu1 %vm275_vm1, %v252_v49  ;;  %1100 = vmatprep.mubr.msk.f32.mxu0 %vm275_vm1, %v252_v49  ;;  %v255_v59 = vmax.f32 %v205_v52, 0.0  ;;  %v260_v3 = vmax.f32 %v230_v63, 0.0  ;;  %v245_v9 = vadd.f32 %v1053_v61, %v1292_v26 }
  0xd6   :  { %1069 = vmatmul.mubr.msk.f32.gmra.mxu1 %vm275_vm1, %v253_v51  ;;  %1101 = vmatmul.mubr.msk.f32.gmra.mxu0 %vm275_vm1, %v253_v51  ;;  %v239_v2 = vpop.f32.mrf.mxu1 }
  0xd7   :  { %v254_v56 = vmax.f32 %v200_v55, 0.0  ;;  %v240_v4 = vadd.f32 %v1292_v26, %v239_v2  ;;  %v263_v10 = vmax.f32 %v245_v9, 0.0 }
  0xd9   :  { %1071 = vmatprep.mubr.msk.f32.mxu1 %vm275_vm1, %v254_v56  ;;  %1103 = vmatprep.mubr.msk.f32.mxu0 %vm275_vm1, %v254_v56  ;;  %v262_v7 = vmax.f32 %v240_v4, 0.0 }
  0xda   :  { %1072 = vmatmul.mubr.msk.f32.gmra.mxu1 %vm275_vm1, %v255_v59  ;;  %1104 = vmatmul.mubr.msk.f32.gmra.mxu0 %vm275_vm1, %v255_v59 }
  0xdb   :  { %1074 = vmatprep.mubr.msk.f32.mxu1 %vm275_vm1, %v256_v57  ;;  %1106 = vmatprep.mubr.msk.f32.mxu0 %vm275_vm1, %v256_v57 }
  0xde   :  { %1075 = vmatmul.mubr.msk.f32.gmra.mxu1 %vm275_vm1, %v257_v0  ;;  %1107 = vmatmul.mubr.msk.f32.gmra.mxu0 %vm275_vm1, %v257_v0 }
  0xdf   :  { %1077 = vmatprep.mubr.msk.f32.mxu1 %vm275_vm1, %v258_v62  ;;  %1109 = vmatprep.mubr.msk.f32.mxu0 %vm275_vm1, %v258_v62 }
  0xe2   :  { %1078 = vmatmul.mubr.msk.f32.gmra.mxu1 %vm275_vm1, %v259_v5  ;;  %1110 = vmatmul.mubr.msk.f32.gmra.mxu0 %vm275_vm1, %v259_v5 }
  0xe3   :  { %1080 = vmatprep.mubr.msk.f32.mxu1 %vm275_vm1, %v260_v3  ;;  %1112 = vmatprep.mubr.msk.f32.mxu0 %vm275_vm1, %v260_v3 }
  0xe6   :  { %1081 = vmatmul.mubr.msk.f32.gmra.mxu1 %vm275_vm1, %v261_v8  ;;  %1113 = vmatmul.mubr.msk.f32.gmra.mxu0 %vm275_vm1, %v261_v8 }
  0xe7   :  { %1083 = vmatprep.mubr.msk.f32.mxu1 %vm275_vm1, %v262_v7  ;;  %1115 = vmatprep.mubr.msk.f32.mxu0 %vm275_vm1, %v262_v7 }
  0xea   :  { %1084 = vmatmul.mubr.msk.f32.gmra.mxu1 %vm275_vm1, %v263_v10  ;;  %1116 = vmatmul.mubr.msk.f32.gmra.mxu0 %vm275_vm1, %v263_v10 }
 0x18e   :  { %v1064_v12 = vpop.f32.mrf.mxu1  ;;  %v1096_v14 = vpop.f32.mrf.mxu0 }
 0x18f   :  { %v632_v15 = vadd.f32 %v1096_v14, %v1345_v11  ;;  %v396_v18 = vadd.f32 %v1064_v12, %v1350_v13 }
 0x190   :  { %v390_v16 = vpop.f32.mrf.mxu1  ;;  %v626_v17 = vpop.f32.mrf.mxu0 }
 0x191   :  { %v906_v19 = vpack.c.bf16 %v632_v15, %v632_v15  ;;  %v391_v20 = vadd.f32 %v1350_v13, %v390_v16  ;;  %v627_v21 = vadd.f32 %v1345_v11, %v626_v17 }
 0x192   :  { %v1067_v22 = vpop.f32.mrf.mxu1  ;;  %v1099_v23 = vpop.f32.mrf.mxu0 }
 0x193   :  { %771 = vst.msk [vmem:[%s1459_s8 + $0x4] sm:$0xf] %vm769_vm2, %v906_v19  ;;  %v924_v24 = vpack.c.bf16 %v396_v18, %v391_v20  ;;  %v905_v25 = vpack.c.bf16 %v627_v21, %v627_v21  ;;  %v642_v26 = vadd.f32 %v1099_v23, %v1345_v11  ;;  %v406_v29 = vadd.f32 %v1067_v22, %v1350_v13 }
 0x194   :  { %v400_v27 = vpop.f32.mrf.mxu1  ;;  %v636_v28 = vpop.f32.mrf.mxu0 }
 0x195   :  { %925 = vst [vmem:[#allocation2] sm:$0xff] %v924_v24   ;;  %770 = vst.msk [vmem:[%s1459_s8] sm:$0xf] %vm769_vm2, %v905_v25  ;;  %v908_v30 = vpack.c.bf16 %v642_v26, %v642_v26  ;;  %v401_v31 = vadd.f32 %v1350_v13, %v400_v27  ;;  %v637_v32 = vadd.f32 %v1345_v11, %v636_v28 }
 0x196   :  { %v1070_v33 = vpop.f32.mrf.mxu1  ;;  %v1102_v34 = vpop.f32.mrf.mxu0 }
 0x197   :  { %773 = vst.msk [vmem:[%s1459_s8 + $0xc] sm:$0xf] %vm769_vm2, %v908_v30  ;;  %v929_v35 = vpack.c.bf16 %v406_v29, %v401_v31  ;;  %v907_v36 = vpack.c.bf16 %v637_v32, %v637_v32  ;;  %v652_v37 = vadd.f32 %v1102_v34, %v1345_v11  ;;  %v416_v40 = vadd.f32 %v1070_v33, %v1350_v13 }
 0x198   :  { %v410_v38 = vpop.f32.mrf.mxu1  ;;  %v646_v39 = vpop.f32.mrf.mxu0 }
 0x199   :  { %961 = vst [vmem:[#allocation2 + $0x8] sm:$0xff] %v929_v35   ;;  %772 = vst.msk [vmem:[%s1459_s8 + $0x8] sm:$0xf] %vm769_vm2, %v907_v36  ;;  %v910_v41 = vpack.c.bf16 %v652_v37, %v652_v37  ;;  %v411_v42 = vadd.f32 %v1350_v13, %v410_v38  ;;  %v647_v43 = vadd.f32 %v1345_v11, %v646_v39 }
 0x19a   :  { %v1073_v44 = vpop.f32.mrf.mxu1  ;;  %v1105_v45 = vpop.f32.mrf.mxu0 }
 0x19b   :  { %775 = vst.msk [vmem:[%s1459_s8 + $0x14] sm:$0xf] %vm769_vm2, %v910_v41  ;;  %v934_v46 = vpack.c.bf16 %v416_v40, %v411_v42  ;;  %v909_v47 = vpack.c.bf16 %v647_v43, %v647_v43  ;;  %v662_v48 = vadd.f32 %v1105_v45, %v1345_v11  ;;  %v426_v51 = vadd.f32 %v1073_v44, %v1350_v13 }
 0x19c   :  { %v420_v49 = vpop.f32.mrf.mxu1  ;;  %v656_v50 = vpop.f32.mrf.mxu0 }
 0x19d   :  { %962 = vst [vmem:[#allocation2 + $0x10] sm:$0xff] %v934_v46   ;;  %774 = vst.msk [vmem:[%s1459_s8 + $0x10] sm:$0xf] %vm769_vm2, %v909_v47  ;;  %v912_v52 = vpack.c.bf16 %v662_v48, %v662_v48  ;;  %v421_v53 = vadd.f32 %v1350_v13, %v420_v49  ;;  %v657_v54 = vadd.f32 %v1345_v11, %v656_v50 }
 0x19e   :  { %v1076_v55 = vpop.f32.mrf.mxu1  ;;  %v1108_v56 = vpop.f32.mrf.mxu0 }
 0x19f   :  { %777 = vst.msk [vmem:[%s1459_s8 + $0x1c] sm:$0xf] %vm769_vm2, %v912_v52  ;;  %v939_v57 = vpack.c.bf16 %v426_v51, %v421_v53  ;;  %v911_v58 = vpack.c.bf16 %v657_v54, %v657_v54  ;;  %v672_v59 = vadd.f32 %v1108_v56, %v1345_v11  ;;  %v436_v62 = vadd.f32 %v1076_v55, %v1350_v13 }
 0x1a0   :  { %v430_v60 = vpop.f32.mrf.mxu1  ;;  %v666_v61 = vpop.f32.mrf.mxu0 }
 0x1a1   :  { %963 = vst [vmem:[#allocation2 + $0x18] sm:$0xff] %v939_v57   ;;  %776 = vst.msk [vmem:[%s1459_s8 + $0x18] sm:$0xf] %vm769_vm2, %v911_v58  ;;  %v914_v63 = vpack.c.bf16 %v672_v59, %v672_v59  ;;  %v431_v0 = vadd.f32 %v1350_v13, %v430_v60  ;;  %v667_v1 = vadd.f32 %v1345_v11, %v666_v61 }
 0x1a2   :  { %v1079_v2 = vpop.f32.mrf.mxu1  ;;  %v1111_v3 = vpop.f32.mrf.mxu0 }
 0x1a3   :  { %779 = vst.msk [vmem:[%s1459_s8 + $0x24] sm:$0xf] %vm769_vm2, %v914_v63  ;;  %v944_v4 = vpack.c.bf16 %v436_v62, %v431_v0  ;;  %v913_v5 = vpack.c.bf16 %v667_v1, %v667_v1  ;;  %v682_v6 = vadd.f32 %v1111_v3, %v1345_v11  ;;  %v446_v9 = vadd.f32 %v1079_v2, %v1350_v13 }
 0x1a4   :  { %v440_v7 = vpop.f32.mrf.mxu1  ;;  %v676_v8 = vpop.f32.mrf.mxu0 }
 0x1a5   :  { %964 = vst [vmem:[#allocation2 + $0x20] sm:$0xff] %v944_v4   ;;  %778 = vst.msk [vmem:[%s1459_s8 + $0x20] sm:$0xf] %vm769_vm2, %v913_v5  ;;  %v916_v10 = vpack.c.bf16 %v682_v6, %v682_v6  ;;  %v441_v12 = vadd.f32 %v1350_v13, %v440_v7  ;;  %v677_v14 = vadd.f32 %v1345_v11, %v676_v8 }
 0x1a6   :  { %v1082_v15 = vpop.f32.mrf.mxu1  ;;  %v1114_v16 = vpop.f32.mrf.mxu0 }
 0x1a7   :  { %781 = vst.msk [vmem:[%s1459_s8 + $0x2c] sm:$0xf] %vm769_vm2, %v916_v10  ;;  %v949_v17 = vpack.c.bf16 %v446_v9, %v441_v12  ;;  %v915_v18 = vpack.c.bf16 %v677_v14, %v677_v14  ;;  %v692_v19 = vadd.f32 %v1114_v16, %v1345_v11  ;;  %v456_v22 = vadd.f32 %v1082_v15, %v1350_v13 }
 0x1a8   :  { %v450_v20 = vpop.f32.mrf.mxu1  ;;  %v686_v21 = vpop.f32.mrf.mxu0 }
 0x1a9   :  { %965 = vst [vmem:[#allocation2 + $0x28] sm:$0xff] %v949_v17   ;;  %780 = vst.msk [vmem:[%s1459_s8 + $0x28] sm:$0xf] %vm769_vm2, %v915_v18  ;;  %v918_v23 = vpack.c.bf16 %v692_v19, %v692_v19  ;;  %v451_v24 = vadd.f32 %v1350_v13, %v450_v20  ;;  %v687_v25 = vadd.f32 %v1345_v11, %v686_v21 }
 0x1aa   :  { %v1085_v26 = vpop.f32.mrf.mxu1  ;;  %v1117_v27 = vpop.f32.mrf.mxu0 }
 0x1ab   :  { %783 = vst.msk [vmem:[%s1459_s8 + $0x34] sm:$0xf] %vm769_vm2, %v918_v23  ;;  %v954_v28 = vpack.c.bf16 %v456_v22, %v451_v24  ;;  %v917_v29 = vpack.c.bf16 %v687_v25, %v687_v25  ;;  %v702_v30 = vadd.f32 %v1117_v27, %v1345_v11  ;;  %v466_v33 = vadd.f32 %v1085_v26, %v1350_v13 }
 0x1ac   :  { %v460_v31 = vpop.f32.mrf.mxu1  ;;  %v696_v32 = vpop.f32.mrf.mxu0 }
 0x1ad   :  { %966 = vst [vmem:[#allocation2 + $0x30] sm:$0xff] %v954_v28   ;;  %782 = vst.msk [vmem:[%s1459_s8 + $0x30] sm:$0xf] %vm769_vm2, %v917_v29  ;;  %v920_v34 = vpack.c.bf16 %v702_v30, %v702_v30  ;;  %v461_v35 = vadd.f32 %v1350_v13, %v460_v31  ;;  %v697_v36 = vadd.f32 %v1345_v11, %v696_v32 }
 0x1af   :  { %785 = vst.msk [vmem:[%s1459_s8 + $0x3c] sm:$0xf] %vm769_vm2, %v920_v34  ;;  %v959_v37 = vpack.c.bf16 %v466_v33, %v461_v35  ;;  %v919_v38 = vpack.c.bf16 %v697_v36, %v697_v36 }
 0x1b1   :  { %967 = vst [vmem:[#allocation2 + $0x38] sm:$0xff] %v959_v37   ;;  %784 = vst.msk [vmem:[%s1459_s8 + $0x38] sm:$0xf] %vm769_vm2, %v919_v38 }
 0x1b2   :  { %1136 = shalt.err (!%p1133_p4)
}
 0x1b3   :  { %s1148_s16 = smov 64   ;;  %s1149_s17 = smov 4  }
 0x1b4   :  { %797 = dma.vmem_to_hbm [thread:$0]  %s792_s5, 1024, %s1458_s7, [#allocation3], %s1148_s16, %s1148_s16, %s1149_s17  }
 0x1b5   :  { %1145 = dma.done.wait [#allocation3], 1024  }
 0x1b6   :  { %1146 = vsyncadd [#allocation3], 4294966272 }
 0x1b7   :  { %805 = vsyncpa [#allocation3], 1 }

</bundles_post_ra>
